<compile_context>
chip_gen: v7x
topology: tpu7x:2x2x1
jax: 0.10.0
libtpu: 0.0.40
codegen_flags: <defaults>
</compile_context>

<pallas_src>
import jax
import jax.numpy as jnp
from jax.experimental import pallas as pl
from jax.experimental.pallas import tpu as pltpu

EPS = 1e-5
_LANE = 128
_SUBLANE_BF16 = 16          # bf16 packs 2 rows per sublane -> pad channels to 16
_LANE_TILE_TARGET = 1024    # ~86% of HBM roofline; same target on v5e/v6e/v7x


# ---------------------------------------------------------------------------
# Small helpers
# ---------------------------------------------------------------------------
def _round_up(x, m):
    return ((x + m - 1) // m) * m


def _lane_tile(s):
    return min(_LANE_TILE_TARGET, _round_up(s, _LANE))


def _pad_to(x, axis, size, value=0.0):
    pad = size - x.shape[axis]
    if pad <= 0:
        return x
    widths = [(0, 0)] * x.ndim
    widths[axis] = (0, pad)
    return jnp.pad(x, widths, constant_values=value)


def _vmem_limit(block_bytes):
    # double-buffered blocks + headroom; clamped to a range safe on all parts
    # (64 MiB physical per TC on v7x, 128 MiB on v5e/v6e).
    return int(min(max(2 * block_bytes + (4 << 20), 32 << 20), 64 << 20))


# ---------------------------------------------------------------------------
# Pallas kernels
# ---------------------------------------------------------------------------
def _conv_stats_kernel(x_ref, w_ref, y_ref, sum_ref, ssq_ref):
    """y = W @ x (bf16 MXU, f32 acc); stream y (bf16) to HBM and accumulate
    per-channel sum / sum-of-squares of y in per-batch resident f32 accs.

    Zero-padded lanes/channels give y == 0 and therefore contribute nothing to
    either accumulator; dividing by the true element count keeps stats exact.
    """
    @pl.when(pl.program_id(1) == 0)
    def _():
        sum_ref[...] = jnp.zeros_like(sum_ref)
        ssq_ref[...] = jnp.zeros_like(ssq_ref)

    y = jnp.dot(w_ref[...], x_ref[...], preferred_element_type=jnp.float32)
    y_ref[...] = y.astype(jnp.bfloat16)
    sum_ref[...] += jnp.sum(y, axis=1, keepdims=True)
    ssq_ref[...] += jnp.sum(y * y, axis=1, keepdims=True)


def _scale_shift_relu_kernel(y_ref, scale_ref, shift_ref, o_ref):
    """o = relu(scale * y + shift).  f32 VPU math, bf16 in/out."""
    y = y_ref[...].astype(jnp.float32)
    o_ref[...] = jnp.maximum(y * scale_ref[...] + shift_ref[...],
                             0.0).astype(jnp.bfloat16)


def _add_conv_kernel(a_ref, b_ref, w_ref, o_ref):
    """o = W @ (a + b): residual add (f32 VPU) fused into the final 1x1 conv."""
    s = a_ref[...].astype(jnp.float32) + b_ref[...].astype(jnp.float32)
    o_ref[...] = jnp.dot(w_ref[...], s.astype(jnp.bfloat16),
                         preferred_element_type=jnp.float32)


# ---------------------------------------------------------------------------
# BlockSpecs
# ---------------------------------------------------------------------------
def _act_spec(cp, tile):
    # (B, Cp, Sp) activation: one batch (squeezed) x all channels x `tile` lanes.
    return pl.BlockSpec((pl.Squeezed(), cp, tile), lambda bi, si: (bi, 0, si))


def _param_spec(shape):
    # Small parameter blocks (weights / scale / shift): constant index map.
    return pl.BlockSpec(shape, lambda bi, si: (0, 0))


def _acc_spec(cp):
    # Per-batch resident f32 accumulator, revisited across the lane-tile axis.
    return pl.BlockSpec((pl.Squeezed(), cp, 1), lambda bi, si: (bi, 0, 0))


# ---------------------------------------------------------------------------
# pallas_call wrappers
# ---------------------------------------------------------------------------
def conv_with_stats(x, w_bf16, tile):
    """x: (B, Cin_p, Sp) bf16; w: (Cout_p, Cin_p) bf16.
    Returns y (B, Cout_p, Sp) bf16 plus per-batch f32 sum / sum-of-squares."""
    b, cin_p, sp = x.shape
    cout_p = w_bf16.shape[0]
    grid = (b, sp // tile)
    blk_bytes = 2 * cin_p * tile + 2 * cout_p * cin_p + 2 * cout_p * tile + 8 * cout_p
    return pl.pallas_call(
        _conv_stats_kernel,
        out_shape=(jax.ShapeDtypeStruct((b, cout_p, sp), jnp.bfloat16),
                   jax.ShapeDtypeStruct((b, cout_p, 1), jnp.float32),
                   jax.ShapeDtypeStruct((b, cout_p, 1), jnp.float32)),
        grid_spec=pltpu.PrefetchScalarGridSpec(
            num_scalar_prefetch=0,
            grid=grid,
            in_specs=[_act_spec(cin_p, tile), _param_spec((cout_p, cin_p))],
            out_specs=[_act_spec(cout_p, tile), _acc_spec(cout_p), _acc_spec(cout_p)]),
        compiler_params=pltpu.CompilerParams(
            dimension_semantics=("parallel", "arbitrary"),
            vmem_limit_bytes=_vmem_limit(blk_bytes)),
        cost_estimate=pl.CostEstimate(
            flops=2 * cout_p * cin_p * b * sp + 3 * cout_p * b * sp,
            transcendentals=0,
            bytes_accessed=2 * b * sp * (cin_p + cout_p)),
    )(x, w_bf16)


def scale_shift_relu(y, scale, shift, tile):
    """relu(scale * y + shift), tiled; bf16 in/out, f32 scale/shift."""
    b, cout_p, sp = y.shape
    grid = (b, sp // tile)
    blk_bytes = 4 * cout_p * tile + 8 * cout_p
    return pl.pallas_call(
        _scale_shift_relu_kernel,
        out_shape=jax.ShapeDtypeStruct((b, cout_p, sp), jnp.bfloat16),
        grid_spec=pltpu.PrefetchScalarGridSpec(
            num_scalar_prefetch=0,
            grid=grid,
            in_specs=[_act_spec(cout_p, tile),
                      _param_spec((cout_p, 1)),
                      _param_spec((cout_p, 1))],
            out_specs=_act_spec(cout_p, tile)),
        compiler_params=pltpu.CompilerParams(
            dimension_semantics=("parallel", "parallel"),
            vmem_limit_bytes=_vmem_limit(blk_bytes)),
        cost_estimate=pl.CostEstimate(
            flops=3 * cout_p * b * sp,
            transcendentals=0,
            bytes_accessed=4 * b * sp * cout_p),
    )(y, scale, shift)


def add_conv(a, b_act, w_bf16, tile):
    """(a + b) followed by a 1x1 conv, tiled.  a, b: (B, Cin_p, Sp) bf16."""
    b, cin_p, sp = a.shape
    cout_p = w_bf16.shape[0]
    grid = (b, sp // tile)
    blk_bytes = 4 * cin_p * tile + 2 * cout_p * cin_p + 4 * cout_p * tile
    return pl.pallas_call(
        _add_conv_kernel,
        out_shape=jax.ShapeDtypeStruct((b, cout_p, sp), jnp.float32),
        grid_spec=pltpu.PrefetchScalarGridSpec(
            num_scalar_prefetch=0,
            grid=grid,
            in_specs=[_act_spec(cin_p, tile),
                      _act_spec(cin_p, tile),
                      _param_spec((cout_p, cin_p))],
            out_specs=_act_spec(cout_p, tile)),
        compiler_params=pltpu.CompilerParams(
            dimension_semantics=("parallel", "parallel"),
            vmem_limit_bytes=_vmem_limit(blk_bytes)),
        cost_estimate=pl.CostEstimate(
            flops=2 * cout_p * cin_p * b * sp + cin_p * b * sp,
            transcendentals=0,
            bytes_accessed=b * sp * (4 * cin_p + 4 * cout_p)),
    )(a, b_act, w_bf16)


def _conv_bn_relu_stage(x_bf16, w, gamma, beta, cout_p, n_true, tile):
    """Tiled 1x1 conv + BatchNorm (training-mode batch stats) + ReLU.

    Pass 1: bf16 matmul + per-channel sum / sum-sq of the pre-activation y.
    XLA:    fold BN into (scale, shift) from mean/var of y (exact, tiny).
    Pass 2: scale*y + shift + ReLU, bf16 out.
    """
    cin_p = x_bf16.shape[1]
    w_p = _pad_to(_pad_to(w, 0, cout_p), 1, cin_p).astype(jnp.bfloat16)
    g_p = _pad_to(gamma, 0, cout_p, value=1.0).reshape(cout_p, 1)
    b_p = _pad_to(beta, 0, cout_p, value=0.0).reshape(cout_p, 1)

    y, sums, ssqs = conv_with_stats(x_bf16, w_p, tile)
    inv_n = 1.0 / n_true
    mean = jnp.sum(sums, axis=0) * inv_n                                # (Cout_p,1)
    var = jnp.maximum(jnp.sum(ssqs, axis=0) * inv_n - mean * mean, 0.0)
    scale = g_p * jax.lax.rsqrt(var + EPS)
    shift = b_p - scale * mean
    return scale_shift_relu(y, scale, shift, tile)


# ---------------------------------------------------------------------------
# Module: parameter init + forward
# ---------------------------------------------------------------------------
def init_params(key, channels):
    """Parameters at natural PyTorch shapes (fresh module: BN gamma=1, beta=0)."""
    cm = channels // 2
    k1, k2, k3 = jax.random.split(key, 3)
    return {
        # conv1: Conv2d(channels, channels//2, 1, bias=False) + BN
        "w1": jax.random.normal(k1, (cm, channels), jnp.float32) * 0.1,
        "g1": jnp.ones((cm,), jnp.float32),
        "b1": jnp.zeros((cm,), jnp.float32),
        # FourierUnit conv_layer: Conv2d(2*cm, 2*cm, 1, bias=False) + BN
        #   (defined w.r.t. the PyTorch interleaved [re,im,re,im,...] layout)
        "wfu": jax.random.normal(k2, (2 * cm, 2 * cm), jnp.float32) * 0.1,
        "gfu": jnp.ones((2 * cm,), jnp.float32),
        "bfu": jnp.zeros((2 * cm,), jnp.float32),
        # conv2: Conv2d(channels//2, channels, 1, bias=False)
        "w2": jax.random.normal(k3, (channels, cm), jnp.float32) * 0.1,
    }


def spectral_transform(x, params):
    """SpectralTransform.forward.  x: (B, C, H, W) f32 -> (B, C, H, W) f32."""
    b, c, h, w = x.shape
    cm = c // 2
    s = h * w

    c_p = _round_up(c, _SUBLANE_BF16)
    cm_p = _round_up(cm, _SUBLANE_BF16)
    tile1 = _lane_tile(s)
    s_p = _round_up(s, tile1)

    # ---- conv1: 1x1 conv + BN (batch stats) + ReLU, two tiled passes over y.
    x_f = _pad_to(_pad_to(x.reshape(b, c, s), 1, c_p), 2, s_p).astype(jnp.bfloat16)
    x1_p = _conv_bn_relu_stage(x_f, params["w1"], params["g1"], params["b1"],
                               cout_p=cm_p, n_true=b * s, tile=tile1)

    # ---- FourierUnit.
    # TODO(synk): rfft2/irfft2 have no Pallas primitive; the FFTs run via
    # jnp.fft while the conv+BN+ReLU between them runs in tiled Pallas kernels.
    x1 = x1_p[:, :cm, :s].astype(jnp.float32).reshape(b, cm, h, w)
    ffted = jnp.fft.rfft2(x1, norm="ortho")                     # (B, Cm, H, Wf)
    wf = ffted.shape[-1]
    sf = h * wf
    cfu = 2 * cm
    cfu_p = _round_up(cfu, _SUBLANE_BF16)
    tile2 = _lane_tile(sf)
    sf_p = _round_up(sf, tile2)

    # Block channel layout [all real | all imag] (cheap concat instead of the
    # PyTorch interleave transpose); permute the interleaved-layout conv/BN
    # params to match at trace time -> mathematically identical.
    perm = jnp.concatenate([2 * jnp.arange(cm), 2 * jnp.arange(cm) + 1])
    f2 = jnp.concatenate([jnp.real(ffted), jnp.imag(ffted)], axis=1)  # (B,2Cm,H,Wf)
    f2 = _pad_to(_pad_to(f2.reshape(b, cfu, sf), 1, cfu_p),
                 2, sf_p).astype(jnp.bfloat16)
    ffu_p = _conv_bn_relu_stage(
        f2, params["wfu"][perm][:, perm], params["gfu"][perm], params["bfu"][perm],
        cout_p=cfu_p, n_true=b * sf, tile=tile2)

    re = ffu_p[:, :cm, :sf].astype(jnp.float32).reshape(b, cm, h, wf)
    im = ffu_p[:, cm:cfu, :sf].astype(jnp.float32).reshape(b, cm, h, wf)
    fu_out = jnp.fft.irfft2(jax.lax.complex(re, im), s=(h, w), norm="ortho")

    # ---- conv2 over (x1 + fu_out); residual add fused into the tiled matmul.
    fu_p = _pad_to(_pad_to(fu_out.astype(jnp.float32).reshape(b, cm, s), 1, cm_p),
                   2, s_p).astype(jnp.bfloat16)
    w2 = _pad_to(_pad_to(params["w2"], 0, c_p), 1, cm_p).astype(jnp.bfloat16)
    out_p = add_conv(x1_p, fu_p, w2, tile=tile1)

    return out_p[:, :c, :s].reshape(b, c, h, w)


# ---------------------------------------------------------------------------
if __name__ == "__main__":
    B, C, H, W = 2, 4, 16, 16
    key = jax.random.PRNGKey(0)
    k_x, k_p = jax.random.split(key)

    x = jax.random.normal(k_x, (B, C, H, W), jnp.float32)
    params = init_params(k_p, C)

    out = jax.jit(spectral_transform)(x, params)
    out = jax.block_until_ready(out)

    assert out.shape == (B, C, H, W), out.shape
    assert out.dtype == jnp.float32
    assert bool(jnp.all(jnp.isfinite(out)))
    print("KERNEL_OK")
</pallas_src>

<mosaic_0001>
module attributes {stable_mosaic.version = 11 : i64} {
  func.func @_conv_stats_kernel(%arg0: i32, %arg1: i32, %arg2: memref<1x16x256xbf16, #tpu.memory_space<vmem>>, %arg3: memref<16x16xbf16, #tpu.memory_space<vmem>>, %arg4: memref<1x16x256xbf16, #tpu.memory_space<vmem>>, %arg5: memref<1x16x1xf32, #tpu.memory_space<vmem>>, %arg6: memref<1x16x1xf32, #tpu.memory_space<vmem>>) attributes {dimension_semantics = [#tpu.dimension_semantics<parallel>, #tpu.dimension_semantics<arbitrary>], iteration_bounds = array<i64: 2, 1>, scalar_prefetch = 0 : i64, scratch_operands = 0 : i64, tpu.core_type = #tpu.core_type<tc>, window_params = [{transform_indices = @transform_0, window_bounds = array<i64: 1, 16, 256>}, {pipeline_mode = #tpu.pipeline_mode<synchronous>, transform_indices = @transform_1, window_bounds = array<i64: 16, 16>}, {transform_indices = @transform_2, window_bounds = array<i64: 1, 16, 256>}, {transform_indices = @transform_3, window_bounds = array<i64: 1, 16, 1>}, {transform_indices = @transform_4, window_bounds = array<i64: 1, 16, 1>}]} {
    %c0_i32 = arith.constant 0 : i32
    %0 = arith.cmpi eq, %arg1, %c0_i32 : i32
    %1 = arith.extui %0 : i1 to i32
    %c0_i32_0 = arith.constant 0 : i32
    %2 = arith.cmpi ne, %1, %c0_i32_0 : i32
    scf.if %2 {
      %cst_22 = arith.constant 0.000000e+00 : f32
      %28 = vector.broadcast %cst_22 : f32 to vector<16x1xf32>
      %c0_23 = arith.constant 0 : index
      %c0_24 = arith.constant 0 : index
      %c0_25 = arith.constant 0 : index
      %29 = vector.load %arg5[%c0_23, %c0_24, %c0_25] : memref<1x16x1xf32, #tpu.memory_space<vmem>>, vector<1x16x1xf32>
      %30 = vector.shape_cast %29 : vector<1x16x1xf32> to vector<16x1xf32>
      %31 = vector.shape_cast %28 : vector<16x1xf32> to vector<1x16x1xf32>
      tpu.vector_store %arg5[%c0_23, %c0_24, %c0_25], %31 {strides = array<i32>} : memref<1x16x1xf32, #tpu.memory_space<vmem>>, vector<1x16x1xf32>,
      %cst_26 = arith.constant 0.000000e+00 : f32
      %32 = vector.broadcast %cst_26 : f32 to vector<16x1xf32>
      %c0_27 = arith.constant 0 : index
      %c0_28 = arith.constant 0 : index
      %c0_29 = arith.constant 0 : index
      %33 = vector.load %arg6[%c0_27, %c0_28, %c0_29] : memref<1x16x1xf32, #tpu.memory_space<vmem>>, vector<1x16x1xf32>
      %34 = vector.shape_cast %33 : vector<1x16x1xf32> to vector<16x1xf32>
      %35 = vector.shape_cast %32 : vector<16x1xf32> to vector<1x16x1xf32>
      tpu.vector_store %arg6[%c0_27, %c0_28, %c0_29], %35 {strides = array<i32>} : memref<1x16x1xf32, #tpu.memory_space<vmem>>, vector<1x16x1xf32>,
    } else {
    }
    %c0 = arith.constant 0 : index
    %c0_1 = arith.constant 0 : index
    %3 = vector.load %arg3[%c0, %c0_1] : memref<16x16xbf16, #tpu.memory_space<vmem>>, vector<16x16xbf16>
    %c0_2 = arith.constant 0 : index
    %c0_3 = arith.constant 0 : index
    %c0_4 = arith.constant 0 : index
    %4 = vector.load %arg2[%c0_2, %c0_3, %c0_4] : memref<1x16x256xbf16, #tpu.memory_space<vmem>>, vector<1x16x256xbf16>
    %5 = vector.shape_cast %4 : vector<1x16x256xbf16> to vector<16x256xbf16>
    %cst = arith.constant dense<0.000000e+00> : vector<16x256xf32>
    %6 = tpu.matmul %3, %5, %cst {dimension_numbers = #tpu.dot_dimension_numbers<[1], [0], [0], [1], [0, 0, 1, 1], [], []>} : vector<16x16xbf16>, vector<16x256xbf16>, vector<16x256xf32> -> vector<16x256xf32>
    %7 = arith.truncf %6 : vector<16x256xf32> to vector<16x256xbf16>
    %c0_5 = arith.constant 0 : index
    %c0_6 = arith.constant 0 : index
    %c0_7 = arith.constant 0 : index
    %8 = vector.load %arg4[%c0_5, %c0_6, %c0_7] : memref<1x16x256xbf16, #tpu.memory_space<vmem>>, vector<1x16x256xbf16>
    %9 = vector.shape_cast %8 : vector<1x16x256xbf16> to vector<16x256xbf16>
    %10 = vector.shape_cast %7 : vector<16x256xbf16> to vector<1x16x256xbf16>
    tpu.vector_store %arg4[%c0_5, %c0_6, %c0_7], %10 {strides = array<i32>} : memref<1x16x256xbf16, #tpu.memory_space<vmem>>, vector<1x16x256xbf16>,
    %c0_8 = arith.constant 0 : index
    %c0_9 = arith.constant 0 : index
    %c0_10 = arith.constant 0 : index
    %11 = vector.load %arg5[%c0_8, %c0_9, %c0_10] : memref<1x16x1xf32, #tpu.memory_space<vmem>>, vector<1x16x1xf32>
    %12 = vector.shape_cast %11 : vector<1x16x1xf32> to vector<16x1xf32>
    %cst_11 = arith.constant dense<0.000000e+00> : vector<16xf32>
    %13 = vector.multi_reduction <add>, %6, %cst_11 [1] : vector<16x256xf32> to vector<16xf32>
    %14 = vector.shape_cast %13 : vector<16xf32> to vector<16x1xf32>
    %15 = arith.addf %12, %14 : vector<16x1xf32>
    %c0_12 = arith.constant 0 : index
    %c0_13 = arith.constant 0 : index
    %c0_14 = arith.constant 0 : index
    %16 = vector.load %arg5[%c0_12, %c0_13, %c0_14] : memref<1x16x1xf32, #tpu.memory_space<vmem>>, vector<1x16x1xf32>
    %17 = vector.shape_cast %16 : vector<1x16x1xf32> to vector<16x1xf32>
    %18 = vector.shape_cast %15 : vector<16x1xf32> to vector<1x16x1xf32>
    tpu.vector_store %arg5[%c0_12, %c0_13, %c0_14], %18 {strides = array<i32>} : memref<1x16x1xf32, #tpu.memory_space<vmem>>, vector<1x16x1xf32>,
    %c0_15 = arith.constant 0 : index
    %c0_16 = arith.constant 0 : index
    %c0_17 = arith.constant 0 : index
    %19 = vector.load %arg6[%c0_15, %c0_16, %c0_17] : memref<1x16x1xf32, #tpu.memory_space<vmem>>, vector<1x16x1xf32>
    %20 = vector.shape_cast %19 : vector<1x16x1xf32> to vector<16x1xf32>
    %21 = arith.mulf %6, %6 : vector<16x256xf32>
    %cst_18 = arith.constant dense<0.000000e+00> : vector<16xf32>
    %22 = vector.multi_reduction <add>, %21, %cst_18 [1] : vector<16x256xf32> to vector<16xf32>
    %23 = vector.shape_cast %22 : vector<16xf32> to vector<16x1xf32>
    %24 = arith.addf %20, %23 : vector<16x1xf32>
    %c0_19 = arith.constant 0 : index
    %c0_20 = arith.constant 0 : index
    %c0_21 = arith.constant 0 : index
    %25 = vector.load %arg6[%c0_19, %c0_20, %c0_21] : memref<1x16x1xf32, #tpu.memory_space<vmem>>, vector<1x16x1xf32>
    %26 = vector.shape_cast %25 : vector<1x16x1xf32> to vector<16x1xf32>
    %27 = vector.shape_cast %24 : vector<16x1xf32> to vector<1x16x1xf32>
    tpu.vector_store %arg6[%c0_19, %c0_20, %c0_21], %27 {strides = array<i32>} : memref<1x16x1xf32, #tpu.memory_space<vmem>>, vector<1x16x1xf32>,
    return
  }
  func.func @transform_0(%arg0: i32, %arg1: i32) -> (i32, i32, i32) {
    %c0_i32 = arith.constant 0 : i32
    %c0_i32_0 = arith.constant 0 : i32
    return %arg0, %c0_i32, %arg1 : i32, i32, i32
  }
  func.func @transform_1(%arg0: i32, %arg1: i32) -> (i32, i32) {
    %c0_i32 = arith.constant 0 : i32
    %c0_i32_0 = arith.constant 0 : i32
    %c0_i32_1 = arith.constant 0 : i32
    return %c0_i32, %c0_i32_0 : i32, i32
  }
  func.func @transform_2(%arg0: i32, %arg1: i32) -> (i32, i32, i32) {
    %c0_i32 = arith.constant 0 : i32
    %c0_i32_0 = arith.constant 0 : i32
    return %arg0, %c0_i32, %arg1 : i32, i32, i32
  }
  func.func @transform_3(%arg0: i32, %arg1: i32) -> (i32, i32, i32) {
    %c0_i32 = arith.constant 0 : i32
    %c0_i32_0 = arith.constant 0 : i32
    %c0_i32_1 = arith.constant 0 : i32
    return %arg0, %c0_i32, %c0_i32_0 : i32, i32, i32
  }
  func.func @transform_4(%arg0: i32, %arg1: i32) -> (i32, i32, i32) {
    %c0_i32 = arith.constant 0 : i32
    %c0_i32_0 = arith.constant 0 : i32
    %c0_i32_1 = arith.constant 0 : i32
    return %arg0, %c0_i32, %c0_i32_0 : i32, i32, i32
  }
}

module attributes {stable_mosaic.version = 11 : i64} {
  func.func @_scale_shift_relu_kernel(%arg0: i32, %arg1: i32, %arg2: memref<1x16x256xbf16, #tpu.memory_space<vmem>>, %arg3: memref<16x1xf32, #tpu.memory_space<vmem>>, %arg4: memref<16x1xf32, #tpu.memory_space<vmem>>, %arg5: memref<1x16x256xbf16, #tpu.memory_space<vmem>>) attributes {dimension_semantics = [#tpu.dimension_semantics<parallel>, #tpu.dimension_semantics<parallel>], iteration_bounds = array<i64: 2, 1>, scalar_prefetch = 0 : i64, scratch_operands = 0 : i64, tpu.core_type = #tpu.core_type<tc>, window_params = [{transform_indices = @transform_0, window_bounds = array<i64: 1, 16, 256>}, {pipeline_mode = #tpu.pipeline_mode<synchronous>, transform_indices = @transform_1, window_bounds = array<i64: 16, 1>}, {pipeline_mode = #tpu.pipeline_mode<synchronous>, transform_indices = @transform_2, window_bounds = array<i64: 16, 1>}, {transform_indices = @transform_3, window_bounds = array<i64: 1, 16, 256>}]} {
    %c0 = arith.constant 0 : index
    %c0_0 = arith.constant 0 : index
    %c0_1 = arith.constant 0 : index
    %0 = vector.load %arg2[%c0, %c0_0, %c0_1] : memref<1x16x256xbf16, #tpu.memory_space<vmem>>, vector<1x16x256xbf16>
    %1 = vector.shape_cast %0 : vector<1x16x256xbf16> to vector<16x256xbf16>
    %2 = arith.extf %1 : vector<16x256xbf16> to vector<16x256xf32>
    %c0_2 = arith.constant 0 : index
    %c0_3 = arith.constant 0 : index
    %3 = vector.load %arg3[%c0_2, %c0_3] : memref<16x1xf32, #tpu.memory_space<vmem>>, vector<16x1xf32>
    %4 = vector.broadcast %3 : vector<16x1xf32> to vector<16x256xf32>
    %5 = arith.mulf %2, %4 : vector<16x256xf32>
    %c0_4 = arith.constant 0 : index
    %c0_5 = arith.constant 0 : index
    %6 = vector.load %arg4[%c0_4, %c0_5] : memref<16x1xf32, #tpu.memory_space<vmem>>, vector<16x1xf32>
    %7 = vector.broadcast %6 : vector<16x1xf32> to vector<16x256xf32>
    %8 = arith.addf %5, %7 : vector<16x256xf32>
    %cst = arith.constant 0.000000e+00 : f32
    %9 = vector.broadcast %cst : f32 to vector<16x256xf32>
    %10 = arith.maximumf %8, %9 : vector<16x256xf32>
    %11 = arith.truncf %10 : vector<16x256xf32> to vector<16x256xbf16>
    %c0_6 = arith.constant 0 : index
    %c0_7 = arith.constant 0 : index
    %c0_8 = arith.constant 0 : index
    %12 = vector.load %arg5[%c0_6, %c0_7, %c0_8] : memref<1x16x256xbf16, #tpu.memory_space<vmem>>, vector<1x16x256xbf16>
    %13 = vector.shape_cast %12 : vector<1x16x256xbf16> to vector<16x256xbf16>
    %14 = vector.shape_cast %11 : vector<16x256xbf16> to vector<1x16x256xbf16>
    tpu.vector_store %arg5[%c0_6, %c0_7, %c0_8], %14 {strides = array<i32>} : memref<1x16x256xbf16, #tpu.memory_space<vmem>>, vector<1x16x256xbf16>,
    return
  }
  func.func @transform_0(%arg0: i32, %arg1: i32) -> (i32, i32, i32) {
    %c0_i32 = arith.constant 0 : i32
    %c0_i32_0 = arith.constant 0 : i32
    return %arg0, %c0_i32, %arg1 : i32, i32, i32
  }
  func.func @transform_1(%arg0: i32, %arg1: i32) -> (i32, i32) {
    %c0_i32 = arith.constant 0 : i32
    %c0_i32_0 = arith.constant 0 : i32
    %c0_i32_1 = arith.constant 0 : i32
    return %c0_i32, %c0_i32_0 : i32, i32
  }
  func.func @transform_2(%arg0: i32, %arg1: i32) -> (i32, i32) {
    %c0_i32 = arith.constant 0 : i32
    %c0_i32_0 = arith.constant 0 : i32
    %c0_i32_1 = arith.constant 0 : i32
    return %c0_i32, %c0_i32_0 : i32, i32
  }
  func.func @transform_3(%arg0: i32, %arg1: i32) -> (i32, i32, i32) {
    %c0_i32 = arith.constant 0 : i32
    %c0_i32_0 = arith.constant 0 : i32
    return %arg0, %c0_i32, %arg1 : i32, i32, i32
  }
}

module attributes {stable_mosaic.version = 11 : i64} {
  func.func @_add_conv_kernel(%arg0: i32, %arg1: i32, %arg2: memref<1x16x256xbf16, #tpu.memory_space<vmem>>, %arg3: memref<1x16x256xbf16, #tpu.memory_space<vmem>>, %arg4: memref<16x16xbf16, #tpu.memory_space<vmem>>, %arg5: memref<1x16x256xf32, #tpu.memory_space<vmem>>) attributes {dimension_semantics = [#tpu.dimension_semantics<parallel>, #tpu.dimension_semantics<parallel>], iteration_bounds = array<i64: 2, 1>, scalar_prefetch = 0 : i64, scratch_operands = 0 : i64, tpu.core_type = #tpu.core_type<tc>, window_params = [{transform_indices = @transform_0, window_bounds = array<i64: 1, 16, 256>}, {transform_indices = @transform_1, window_bounds = array<i64: 1, 16, 256>}, {pipeline_mode = #tpu.pipeline_mode<synchronous>, transform_indices = @transform_2, window_bounds = array<i64: 16, 16>}, {transform_indices = @transform_3, window_bounds = array<i64: 1, 16, 256>}]} {
    %c0 = arith.constant 0 : index
    %c0_0 = arith.constant 0 : index
    %c0_1 = arith.constant 0 : index
    %0 = vector.load %arg2[%c0, %c0_0, %c0_1] : memref<1x16x256xbf16, #tpu.memory_space<vmem>>, vector<1x16x256xbf16>
    %1 = vector.shape_cast %0 : vector<1x16x256xbf16> to vector<16x256xbf16>
    %2 = arith.extf %1 : vector<16x256xbf16> to vector<16x256xf32>
    %c0_2 = arith.constant 0 : index
    %c0_3 = arith.constant 0 : index
    %c0_4 = arith.constant 0 : index
    %3 = vector.load %arg3[%c0_2, %c0_3, %c0_4] : memref<1x16x256xbf16, #tpu.memory_space<vmem>>, vector<1x16x256xbf16>
    %4 = vector.shape_cast %3 : vector<1x16x256xbf16> to vector<16x256xbf16>
    %5 = arith.extf %4 : vector<16x256xbf16> to vector<16x256xf32>
    %6 = arith.addf %2, %5 : vector<16x256xf32>
    %c0_5 = arith.constant 0 : index
    %c0_6 = arith.constant 0 : index
    %7 = vector.load %arg4[%c0_5, %c0_6] : memref<16x16xbf16, #tpu.memory_space<vmem>>, vector<16x16xbf16>
    %8 = arith.truncf %6 : vector<16x256xf32> to vector<16x256xbf16>
    %cst = arith.constant dense<0.000000e+00> : vector<16x256xf32>
    %9 = tpu.matmul %7, %8, %cst {dimension_numbers = #tpu.dot_dimension_numbers<[1], [0], [0], [1], [0, 0, 1, 1], [], []>} : vector<16x16xbf16>, vector<16x256xbf16>, vector<16x256xf32> -> vector<16x256xf32>
    %c0_7 = arith.constant 0 : index
    %c0_8 = arith.constant 0 : index
    %c0_9 = arith.constant 0 : index
    %10 = vector.load %arg5[%c0_7, %c0_8, %c0_9] : memref<1x16x256xf32, #tpu.memory_space<vmem>>, vector<1x16x256xf32>
    %11 = vector.shape_cast %10 : vector<1x16x256xf32> to vector<16x256xf32>
    %12 = vector.shape_cast %9 : vector<16x256xf32> to vector<1x16x256xf32>
    tpu.vector_store %arg5[%c0_7, %c0_8, %c0_9], %12 {strides = array<i32>} : memref<1x16x256xf32, #tpu.memory_space<vmem>>, vector<1x16x256xf32>,
    return
  }
  func.func @transform_0(%arg0: i32, %arg1: i32) -> (i32, i32, i32) {
    %c0_i32 = arith.constant 0 : i32
    %c0_i32_0 = arith.constant 0 : i32
    return %arg0, %c0_i32, %arg1 : i32, i32, i32
  }
  func.func @transform_1(%arg0: i32, %arg1: i32) -> (i32, i32, i32) {
    %c0_i32 = arith.constant 0 : i32
    %c0_i32_0 = arith.constant 0 : i32
    return %arg0, %c0_i32, %arg1 : i32, i32, i32
  }
  func.func @transform_2(%arg0: i32, %arg1: i32) -> (i32, i32) {
    %c0_i32 = arith.constant 0 : i32
    %c0_i32_0 = arith.constant 0 : i32
    %c0_i32_1 = arith.constant 0 : i32
    return %c0_i32, %c0_i32_0 : i32, i32
  }
  func.func @transform_3(%arg0: i32, %arg1: i32) -> (i32, i32, i32) {
    %c0_i32 = arith.constant 0 : i32
    %c0_i32_0 = arith.constant 0 : i32
    return %arg0, %c0_i32, %arg1 : i32, i32, i32
  }
}

</mosaic_0001>

<bundles_post_ra>
// kernel: spectral_transform.5
= control target key start
LH: loop header
LB: loop body
LE: loop exit
PB: predicated region body
PF: predicated region fallthrough
CT: control target
= control target key end

     0   :  { %s642_s15 = smov 0   ;;  %s644_s16 = smov 0   ;;  %s708_s0 = inlined_call_operand.vmem [shape: bf16[2,16,256], index: 0, kind: input, shape index: {}]   ;;  %s709_s1 = inlined_call_operand.vmem [shape: bf16[16,16], index: 1, kind: input, shape index: {}]   ;;  %s710_s2 = inlined_call_operand.vmem [shape: bf16[2,16,256], index: 2, kind: output, shape index: {0}]   ;;  %s711_s3 = inlined_call_operand.vmem [shape: f32[2,16,1], index: 3, kind: output, shape index: {1}]   ;;  %s712_s4 = inlined_call_operand.vmem [shape: f32[2,16,1], index: 4, kind: output, shape index: {2}]  }
   0x1   :  { %s646_s17 = smov 0  }
   0x2 LB: > { %s27_s18 = sadd.s32 1, %s609_s16  ;;  %p538_p0 = scmp.ge.s32.totalorder %s613_s17, 1  ;;  %s613_s17 = sphi %s646_s17, %s15_s17   ;;  %s609_s16 = sphi %s644_s16, %s714_s16   ;;  %s605_s15 = sphi %s642_s15, %s713_s15  }
   0x3   : > { %p29_p1 = scmp.ge.s32.totalorder %s27_s18, 2  ;;  %p188_p2 = scmp.lt.s32.totalorder %s613_s17, 3 }
   0x5   : > { %s716_s18 = smov (%p29_p1, %s27_s18), 0  ;;  %p189_p3 = pnand %p538_p0, %p188_p2 }
   0x6   : > { %p233_p4 = scmp.lt.s32.totalorder (!%p189_p3), %s605_s15, 1  ;;  %v615_v0 = vmov (!%p189_p3), 0   ;;  %v590_v3 = vld [vmem:[%s709_s1] sm:$0xff] (!%p189_p3)   ;;  %vm291_vm0 = vcmask (!%p189_p3), 130048   ;;  %vm267_vm1 = vcmask (!%p189_p3), 7168   ;;  %v616_v4 = vmov (!%p189_p3), 0.0  }
   0x7   : > { %192 = sbr.rel (%p189_p3) target bundleno = 388 (0x184), region = 28  ;;  %327 = vmatprep.mubr.bf16.mxu0 (!%p189_p3), %v615_v0 }
   0xe   : > { %s718_s15 = smov (!%p233_p4, %s605_s15), 1 }
   0xf   : > { %s555_s19 = sshll.u32 %s718_s15, 4 }
  0x10   : > { %s240_s22 = scalar_lea.vmem %s708_s0, %s555_s19  ;;  %s669_s27 = scalar_lea.vmem %s711_s3, %s555_s19 }
  0x11   : > { %v587_v1 = vld [vmem:[%s240_s22 + $0x4] ss:$8 sps:$4 sm:$0xff]   ;;  %v589_v2 = vld [vmem:[%s240_s22] ss:$8 sps:$4 sm:$0xff]   ;;  %s674_s30 = scalar_lea.vmem %s712_s4, %s555_s19  ;;  %268 = vst.msk [vmem:[%s669_s27] sm:$0xff] %vm267_vm1, %v616_v4  ;;  %269 = vst.msk [vmem:[%s669_s27 + $0x8] sm:$0xff] %vm267_vm1, %v616_v4  ;;  %s250_s7 = scalar_lea.vmem %s710_s2, %s555_s19 }
  0x12   : > { %295 = vmatprep.subr.bf16.mxu0 %v587_v1  ;;  %270 = vst.msk [vmem:[%s674_s30] sm:$0xff] %vm267_vm1, %v616_v4  ;;  %271 = vst.msk [vmem:[%s674_s30 + $0x8] sm:$0xff] %vm267_vm1, %v616_v4 }
  0x13   : > { %296 = vmatpush1.bf16.msra.mxu0 %v589_v2 }
  0x16   : > { %550 = vmatmul.mubr.msk.bf16.vlgmr.msra.gmra.mrb[0].mxu0 %vm291_vm0, %v590_v3 }
  0x18   : > { %v352_v19 = vld [vmem:[%s669_s27] sm:$0xff]  ;;  %v353_v24 = vld [vmem:[%s669_s27 + $0x8] sm:$0xff] }
  0x19   : > { %v365_v21 = vld [vmem:[%s674_s30] sm:$0xff]  ;;  %v366_v27 = vld [vmem:[%s674_s30 + $0x8] sm:$0xff] }
  0xe9   : > { %v329_v5 = vpop.f32.mrb[0].mxu0 }
  0xea   : > { %v331_v6 = vpop.f32.mrb[1].mxu0  ;;  %v367_v7 = vmul.f32 %v329_v5, %v329_v5 }
  0xeb   : > { %v559_v8 = vpack.c.bf16 %v331_v6, %v329_v5  ;;  %v333_v9 = vpop.f32.mrb[2].mxu0  ;;  %v354_v10 = vadd.f32 %v331_v6, %v329_v5  ;;  %v368_v11 = vmul.f32 %v331_v6, %v331_v6 }
  0xec   : > { %v335_v12 = vpop.f32.mrb[3].mxu0  ;;  %v369_v13 = vmul.f32 %v333_v9, %v333_v9 }
  0xed   : > { %v560_v14 = vpack.c.bf16 %v335_v12, %v333_v9  ;;  %350 = vst [vmem:[%s250_s7] sm:$0xff] %v559_v8  ;;  %v370_v15 = vmul.f32 %v335_v12, %v335_v12  ;;  %355 = vadd.xlane.f32.xlu0 %v354_v10  ;;  %v371_v16 = vadd.f32 %v368_v11, %v367_v7 }
  0xee   : > { %v357_v17 = vadd.f32 %v335_v12, %v333_v9 }
  0xef   : > { %351 = vst [vmem:[%s250_s7 + $0x8] sm:$0xff] %v560_v14  ;;  %372 = vadd.xlane.f32.xlu1 %v371_v16  ;;  %v374_v18 = vadd.f32 %v370_v15, %v369_v13 }
  0xf1   : > { %358 = vadd.xlane.f32.xlu0 %v357_v17 }
  0xf3   : > { %375 = vadd.xlane.f32.xlu1 %v374_v18 }
 0x17a   : > { %v356_v20 = vpop.xlane.xlu0 %355 }
 0x17b   : > { %v360_v22 = vadd.f32 %v356_v20, %v352_v19 }
 0x17c   : > { %v373_v23 = vpop.xlane.xlu1 %372 }
 0x17d   : > { %363 = vst.msk [vmem:[%s669_s27] sm:$0xff] %vm267_vm1, %v360_v22  ;;  %v377_v25 = vadd.f32 %v373_v23, %v365_v21 }
 0x17e   : > { %v359_v26 = vpop.xlane.xlu0 %358 }
 0x17f   : > { %379 = vst.msk [vmem:[%s674_s30] sm:$0xff] %vm267_vm1, %v377_v25  ;;  %v361_v28 = vadd.f32 %v359_v26, %v353_v24 }
 0x180   : > { %v376_v29 = vpop.xlane.xlu1 %375 }
 0x181   : > { %364 = vst.msk [vmem:[%s669_s27 + $0x8] sm:$0xff] %vm267_vm1, %v361_v28  ;;  %v378_v30 = vadd.f32 %v376_v29, %v366_v27 }
 0x183   : > { %380 = vst.msk [vmem:[%s674_s30 + $0x8] sm:$0xff] %vm267_vm1, %v378_v30 }
 0x184 PF: > { %s15_s17 = sadd.s32 1, %s613_s17   ;;  %s713_s15 = smov %s609_s16 }
 0x185   : > { %p12_p5 = scmp.ge.s32.totalorder %s15_s17, 4   ;;  %s714_s16 = smov %s716_s18 }
 0x187   :  { %14 = sbr.rel (!%p12_p5) target bundleno = 2 (0x2), region = 86 }

// kernel: spectral_transform.6
= control target key start
LH: loop header
LB: loop body
LE: loop exit
PB: predicated region body
PF: predicated region fallthrough
CT: control target
= control target key end

     0   :  { %s442_s12 = smov 0   ;;  %s444_s13 = smov 0   ;;  %s487_s0 = inlined_call_operand.vmem [shape: bf16[2,16,256], index: 0, kind: input, shape index: {}]   ;;  %s488_s1 = inlined_call_operand.vmem [shape: f32[16,1], index: 1, kind: input, shape index: {}]   ;;  %s489_s2 = inlined_call_operand.vmem [shape: f32[16,1], index: 2, kind: input, shape index: {}]   ;;  %s490_s3 = inlined_call_operand.vmem [shape: bf16[2,16,256], index: 3, kind: output, shape index: {}]  }
   0x1   :  { %s446_s14 = smov 0  }
   0x2 LB: > { %s25_s15 = sadd.s32 1, %s415_s13  ;;  %p357_p0 = scmp.ge.s32.totalorder %s419_s14, 1  ;;  %s419_s14 = sphi %s446_s14, %s13_s14   ;;  %s415_s13 = sphi %s444_s13, %s492_s13   ;;  %s411_s12 = sphi %s442_s12, %s491_s12  }
   0x3   : > { %p27_p1 = scmp.ge.s32.totalorder %s25_s15, 2  ;;  %p158_p2 = scmp.lt.s32.totalorder %s419_s14, 3 }
   0x5   : > { %s494_s15 = smov (%p27_p1, %s25_s15), 0  ;;  %p159_p3 = pnand %p357_p0, %p158_p2 }
   0x6   : > { %v232_v0 = vld [vmem:[%s489_s2] sm:$0xff] (!%p159_p3)  ;;  %v421_v2 = vmov (!%p159_p3), 0   ;;  %v233_v3 = vld [vmem:[%s489_s2 + $0x8] sm:$0xff] (!%p159_p3)  ;;  %p191_p4 = scmp.lt.s32.totalorder (!%p159_p3), %s411_s12, 1 }
   0x7   : > { %162 = sbr.rel (%p159_p3) target bundleno = 149 (0x95), region = 32  ;;  %v216_v1 = vld [vmem:[%s488_s1] sm:$0xff] (!%p159_p3)  ;;  %396 = vset.pattern.permute.xlu1 (!%p159_p3), %v421_v2  ;;  %395 = vset.pattern.permute.xlu0 (!%p159_p3), %v421_v2  ;;  %v217_v4 = vld [vmem:[%s488_s1 + $0x8] sm:$0xff] (!%p159_p3) }
   0x8   : > { %236 = vperm.xlu1 (!%p159_p3), %396, %v232_v0   ;;  %220 = vperm.xlu0 (!%p159_p3), %395, %v216_v1  }
   0xc   : > { %241 = vperm.xlu1 (!%p159_p3), %396, %v233_v3   ;;  %225 = vperm.xlu0 (!%p159_p3), %395, %v217_v4  }
   0xe   : > { %s496_s12 = smov (!%p191_p4, %s411_s12), 1 }
   0xf   : > { %s366_s24 = sshll.u32 %s496_s12, 4 }
  0x10   : > { %s198_s27 = scalar_lea.vmem %s487_s0, %s366_s24  ;;  %s208_s30 = scalar_lea.vmem %s490_s3, %s366_s24 }
  0x11   : > { %v210_v5 = vld [vmem:[%s198_s27] sm:$0xff]  ;;  %v211_v8 = vld [vmem:[%s198_s27 + $0x8] sm:$0xff] }
  0x12   : > { %v212_v6 = vunpack.c.l.bf16 %v210_v5  ;;  %v213_v7 = vunpack.c.h.bf16 %v210_v5  ;;  %v214_v13 = vunpack.c.l.bf16 %v211_v8  ;;  %v215_v14 = vunpack.c.h.bf16 %v211_v8 }
  0x87   : > { %v237_v9 = vpop.permute.xlu1 %236  ;;  %v221_v10 = vpop.permute.xlu0 %220 }
  0x88   : > { %v228_v11 = vmul.f32 %v221_v10, %v212_v6  ;;  %v229_v12 = vmul.f32 %v221_v10, %v213_v7 }
  0x8a   : > { %v244_v15 = vadd.f32 %v237_v9, %v228_v11  ;;  %v245_v16 = vadd.f32 %v237_v9, %v229_v12 }
  0x8b   : > { %v226_v17 = vpop.permute.xlu0 %225  ;;  %v242_v22 = vpop.permute.xlu1 %241 }
  0x8c   : > { %v248_v18 = vmax.f32 %v244_v15, 0.0  ;;  %v249_v19 = vmax.f32 %v245_v16, 0.0  ;;  %v230_v20 = vmul.f32 %v226_v17, %v214_v13  ;;  %v231_v21 = vmul.f32 %v226_v17, %v215_v14 }
  0x8e   : > { %v368_v23 = vpack.c.bf16 %v249_v19, %v248_v18  ;;  %v246_v24 = vadd.f32 %v242_v22, %v230_v20  ;;  %v247_v25 = vadd.f32 %v242_v22, %v231_v21 }
  0x90   : > { %264 = vst [vmem:[%s208_s30] sm:$0xff] %v368_v23  ;;  %v250_v26 = vmax.f32 %v246_v24, 0.0  ;;  %v251_v27 = vmax.f32 %v247_v25, 0.0 }
  0x92   : > { %v369_v28 = vpack.c.bf16 %v251_v27, %v250_v26 }
  0x94   : > { %265 = vst [vmem:[%s208_s30 + $0x8] sm:$0xff] %v369_v28 }
  0x95 PF: > { %s13_s14 = sadd.s32 1, %s419_s14   ;;  %s491_s12 = smov %s415_s13 }
  0x96   : > { %p10_p5 = scmp.ge.s32.totalorder %s13_s14, 4   ;;  %s492_s13 = smov %s494_s15 }
  0x98   :  { %12 = sbr.rel (!%p10_p5) target bundleno = 2 (0x2), region = 62 }

// kernel: reverse.0
= control target key start
LH: loop header
LB: loop body
LE: loop exit
PB: predicated region body
PF: predicated region fallthrough
CT: control target
= control target key end

     0   :  { %v55_v3 = vlaneseq  ;;  %v48_v5 = vld [vmem:[#allocation0 + $0x7] ss:$-1 sm:$0xff]  ;;  %v62_v6 = vld [vmem:[#allocation0 + $0x17] ss:$-1 sm:$0xff]  ;;  %s197_s0 = inlined_call_operand.vmem [shape: f32[2,2,16,7], index: 0, kind: input, shape index: {}]   ;;  %s198_s1 = inlined_call_operand.vmem [shape: f32[2,2,16,7], index: 1, kind: output, shape index: {}]  }
   0x1   :  { %v36_v0 = vld [vmem:[%s197_s0] sm:$0xff]  ;;  %v38_v1 = vld [vmem:[%s197_s0 + $0x8] sm:$0xff]  ;;  %v40_v2 = vld [vmem:[%s197_s0 + $0x10] sm:$0xff]  ;;  %v49_v7 = vrot.slane %v48_v5, 1  ;;  %v63_v8 = vrot.slane %v62_v6, 1 }
   0x2   :  { %37 = vst [vmem:[#allocation0 + $0x8] sm:$0xff] %v36_v0  ;;  %39 = vst [vmem:[#allocation0 + $0x18] sm:$0xff] %v38_v1  ;;  %v42_v4 = vld [vmem:[%s197_s0 + $0x18] sm:$0xff]  ;;  %v76_v9 = vld [vmem:[#allocation0 + $0x27] ss:$-1 sm:$0xff]  ;;  %v56_v10 = vshrl.u32 %v55_v3, 7 }
   0x3   :  { %41 = vst [vmem:[#allocation0 + $0x28] sm:$0xff] %v40_v2  ;;  %43 = vst [vmem:[#allocation0 + $0x38] sm:$0xff] %v42_v4  ;;  %v77_v11 = vrot.slane %v76_v9, 1  ;;  %v90_v12 = vld [vmem:[#allocation0 + $0x37] ss:$-1 sm:$0xff] }
   0x4   :  { %50 = vst [vmem:[#allocation1] sm:$0xff] %v49_v7  ;;  %64 = vst [vmem:[#allocation1 + $0x8] sm:$0xff] %v63_v8  ;;  %v91_v13 = vrot.slane %v90_v12, 1  ;;  %vm57_vm0 = vcmp.lt.s32.totalorder %v56_v10, 7 }
   0x5   :  { %78 = vst [vmem:[#allocation1 + $0x10] sm:$0xff] %v77_v11 }
   0x6   :  { %92 = vst [vmem:[#allocation1 + $0x18] sm:$0xff] %v91_v13 }
   0x9   :  { %v53_v14 = vld [vmem:[#allocation0 + $0xf] ss:$-1 sm:$0xff]  ;;  %v67_v15 = vld [vmem:[#allocation0 + $0x1f] ss:$-1 sm:$0xff] }
   0xa   :  { %v81_v16 = vld [vmem:[#allocation0 + $0x2f] ss:$-1 sm:$0xff]  ;;  %v54_v17 = vrot.slane %v53_v14, 1  ;;  %v68_v18 = vrot.slane %v67_v15, 1  ;;  %v95_v20 = vld [vmem:[#allocation0 + $0x3f] ss:$-1 sm:$0xff] }
   0xb   :  { %v82_v19 = vrot.slane %v81_v16, 1  ;;  %v96_v21 = vrot.slane %v95_v20, 1 }
   0xc   :  { %58 = vst.msk [vmem:[#allocation1] sm:$0xff] %vm57_vm0, %v54_v17  ;;  %72 = vst.msk [vmem:[#allocation1 + $0x8] sm:$0xff] %vm57_vm0, %v68_v18 }
   0xd   :  { %86 = vst.msk [vmem:[#allocation1 + $0x10] sm:$0xff] %vm57_vm0, %v82_v19  ;;  %100 = vst.msk [vmem:[#allocation1 + $0x18] sm:$0xff] %vm57_vm0, %v96_v21 }
  0x13   :  { %v134_v22 = vld [vmem:[#allocation1] sm:$0xff]  ;;  %v136_v23 = vld [vmem:[#allocation1 + $0x8] sm:$0xff] }
  0x14   :  { %v138_v24 = vld [vmem:[#allocation1 + $0x10] sm:$0xff]  ;;  %135 = vst [vmem:[%s198_s1] sm:$0xff] %v134_v22  ;;  %137 = vst [vmem:[%s198_s1 + $0x8] sm:$0xff] %v136_v23  ;;  %v140_v25 = vld [vmem:[#allocation1 + $0x18] sm:$0xff] }
  0x15   :  { %139 = vst [vmem:[%s198_s1 + $0x10] sm:$0xff] %v138_v24  ;;  %141 = vst [vmem:[%s198_s1 + $0x18] sm:$0xff] %v140_v25 }

// kernel: spectral_transform.9
= control target key start
LH: loop header
LB: loop body
LE: loop exit
PB: predicated region body
PF: predicated region fallthrough
CT: control target
= control target key end

     0   :  { %s517_s12 = smov 0   ;;  %s519_s13 = smov 0   ;;  %s560_s0 = inlined_call_operand.vmem [shape: bf16[2,16,256], index: 0, kind: input, shape index: {}]   ;;  %s561_s1 = inlined_call_operand.vmem [shape: bf16[2,16,256], index: 1, kind: input, shape index: {}]   ;;  %s562_s2 = inlined_call_operand.vmem [shape: bf16[16,16], index: 2, kind: input, shape index: {}]   ;;  %s563_s3 = inlined_call_operand.vmem [shape: f32[2,16,256], index: 3, kind: output, shape index: {}]  }
   0x1   :  { %s521_s14 = smov 0  }
   0x2 LB: > { %s25_s15 = sadd.s32 1, %s490_s13  ;;  %p432_p0 = scmp.ge.s32.totalorder %s494_s14, 1  ;;  %s494_s14 = sphi %s521_s14, %s13_s14   ;;  %s490_s13 = sphi %s519_s13, %s565_s13   ;;  %s486_s12 = sphi %s517_s12, %s564_s12  }
   0x3   : > { %p27_p1 = scmp.ge.s32.totalorder %s25_s15, 2  ;;  %p175_p2 = scmp.lt.s32.totalorder %s494_s14, 3 }
   0x5   : > { %s567_s15 = smov (%p27_p1, %s25_s15), 0  ;;  %p176_p3 = pnand %p432_p0, %p175_p2 }
   0x6   : > { %p217_p4 = scmp.lt.s32.totalorder (!%p176_p3), %s486_s12, 1  ;;  %v496_v0 = vmov (!%p176_p3), 0   ;;  %v471_v19 = vld [vmem:[%s562_s2] sm:$0xff] (!%p176_p3)   ;;  %vm272_vm0 = vcmask (!%p176_p3), 130048  }
   0x7   : > { %179 = sbr.rel (%p176_p3) target bundleno = 245 (0xf5), region = 32  ;;  %308 = vmatprep.mubr.bf16.mxu0 (!%p176_p3), %v496_v0 }
   0xe   : > { %s569_s12 = smov (!%p217_p4, %s486_s12), 1 }
   0xf   : > { %s443_s16 = sshll.u32 %s569_s12, 4  ;;  %s445_s25 = sshll.u32 %s569_s12, 5 }
  0x10   : > { %s224_s19 = scalar_lea.vmem %s560_s0, %s443_s16  ;;  %s234_s22 = scalar_lea.vmem %s561_s1, %s443_s16 }
  0x11   : > { %v247_v1 = vld [vmem:[%s224_s19] sm:$0xff]  ;;  %v248_v2 = vld [vmem:[%s224_s19 + $0x8] sm:$0xff]  ;;  %s244_s28 = scalar_lea.vmem %s563_s3, %s445_s25 }
  0x12   : > { %v253_v3 = vld [vmem:[%s234_s22] sm:$0xff]  ;;  %v250_v4 = vunpack.c.h.bf16 %v247_v1  ;;  %v252_v5 = vunpack.c.h.bf16 %v248_v2  ;;  %v254_v6 = vld [vmem:[%s234_s22 + $0x8] sm:$0xff]  ;;  %v249_v8 = vunpack.c.l.bf16 %v247_v1  ;;  %v251_v10 = vunpack.c.l.bf16 %v248_v2 }
  0x13   : > { %v256_v7 = vunpack.c.h.bf16 %v253_v3  ;;  %v258_v9 = vunpack.c.h.bf16 %v254_v6  ;;  %v255_v11 = vunpack.c.l.bf16 %v253_v3  ;;  %v257_v12 = vunpack.c.l.bf16 %v254_v6 }
  0x15   : > { %v260_v13 = vadd.f32 %v256_v7, %v250_v4  ;;  %v262_v14 = vadd.f32 %v258_v9, %v252_v5  ;;  %v259_v15 = vadd.f32 %v255_v11, %v249_v8  ;;  %v261_v16 = vadd.f32 %v257_v12, %v251_v10 }
  0x17   : > { %v266_v17 = vpack.c.bf16 %v262_v14, %v260_v13  ;;  %v265_v18 = vpack.c.bf16 %v261_v16, %v259_v15 }
  0x19   : > { %276 = vmatprep.subr.bf16.mxu0 %v266_v17 }
  0x1a   : > { %277 = vmatpush1.bf16.msra.mxu0 %v265_v18 }
  0x1d   : > { %440 = vmatmul.mubr.msk.bf16.vlgmr.msra.gmra.mrb[0].mxu0 %vm272_vm0, %v471_v19 }
  0xf0   : > { %v310_v20 = vpop.f32.mrb[0].mxu0 }
  0xf1   : > { %319 = vst [vmem:[%s244_s28] sm:$0xff] %v310_v20  ;;  %v312_v21 = vpop.f32.mrb[1].mxu0 }
  0xf2   : > { %320 = vst [vmem:[%s244_s28 + $0x8] sm:$0xff] %v312_v21  ;;  %v314_v22 = vpop.f32.mrb[2].mxu0 }
  0xf3   : > { %321 = vst [vmem:[%s244_s28 + $0x10] sm:$0xff] %v314_v22  ;;  %v316_v23 = vpop.f32.mrb[3].mxu0 }
  0xf4   : > { %322 = vst [vmem:[%s244_s28 + $0x18] sm:$0xff] %v316_v23 }
  0xf5 PF: > { %s13_s14 = sadd.s32 1, %s494_s14   ;;  %s564_s12 = smov %s490_s13 }
  0xf6   : > { %p10_p5 = scmp.ge.s32.totalorder %s13_s14, 4   ;;  %s565_s13 = smov %s567_s15 }
  0xf8   :  { %12 = sbr.rel (!%p10_p5) target bundleno = 2 (0x2), region = 65 }

</bundles_post_ra>
